<compile_context>
chip_gen: v5e
topology: v5e:2x2
jax: 0.10.0
libtpu: 0.0.40
codegen_flags: <defaults>
</compile_context>

<pallas_src>
import jax
import jax.numpy as jnp
from jax import lax
from jax.experimental import pallas as pl
from jax.experimental.pallas import tpu as pltpu


def _round_up(x, m):
    return (x + m - 1) // m * m


# ----------------------------------------------------------------------------
# Path 1: degenerate Linear(1, 1)  ->  elementwise affine on the VPU
# ----------------------------------------------------------------------------
def _affine_scalar_kernel(wb_ref, x_ref, o_ref):
    # wb_ref: SMEM f32[2] = [w, b]   (scalars -> sreg, broadcast free in VPU)
    # x_ref / o_ref: full (N, 1) f32 arrays resident in VMEM
    o_ref[...] = x_ref[...] * wb_ref[0] + wb_ref[1]


def _linear_forward_scalar(x, weight, bias):
    """x: (N, 1), weight: (1, 1), bias: (1,) -> (N, 1) float32."""
    x32 = x.astype(jnp.float32)
    wb = jnp.stack(
        [weight.reshape(()).astype(jnp.float32), bias.reshape(()).astype(jnp.float32)]
    )
    return pl.pallas_call(
        _affine_scalar_kernel,
        out_shape=jax.ShapeDtypeStruct(x32.shape, jnp.float32),
        # No grid: single invocation, whole arrays resident, no pipeline
        # prologue/epilogue overhead, no wrapper-side repacking.
        in_specs=[
            pl.BlockSpec(memory_space=pltpu.MemorySpace.SMEM),   # [w, b] scalars
            pl.BlockSpec(memory_space=pltpu.MemorySpace.VMEM),   # x
        ],
        out_specs=pl.BlockSpec(memory_space=pltpu.MemorySpace.VMEM),
    )(wb, x32)


# ----------------------------------------------------------------------------
# Path 2: general Linear (real GEMM shapes) -> tiled MXU kernel
# ----------------------------------------------------------------------------
def _linear_tiled_kernel(x_ref, w_ref, b_ref, o_ref):
    # x_ref: (tm, tk)   w_ref: (tn, tk)  (native nn.Linear layout)
    # b_ref: (1, tn)    o_ref: (tm, tn) f32, resident across the K axis
    k = pl.program_id(2)

    @pl.when(k == 0)
    def _():
        o_ref[...] = jnp.zeros_like(o_ref)

    # Contract the K dimension of x (dim 1) against the K dimension of the
    # untransposed weight (dim 1): (tm, tk) x (tn, tk) -> (tm, tn).
    o_ref[...] += lax.dot_general(
        x_ref[...],
        w_ref[...],
        dimension_numbers=(((1,), (1,)), ((), ())),
        preferred_element_type=jnp.float32,
    )

    @pl.when(k == pl.num_programs(2) - 1)
    def _():
        # Bias added exactly once, after the full K reduction.
        o_ref[...] += b_ref[...]


def _pad_2d(a, rows, cols):
    """Zero-pad a 2-D array to (rows, cols) only if it is not already that shape."""
    r, c = a.shape
    if r == rows and c == cols:
        return a
    return jnp.zeros((rows, cols), a.dtype).at[:r, :c].set(a)


def _linear_forward_tiled(x, weight, bias, *, tm=512, tn=512, tk=512):
    """x: (N, in_f), weight: (out_f, in_f), bias: (out_f,) -> (N, out_f) f32."""
    n, in_f = x.shape
    out_f = weight.shape[0]

    x32 = x.astype(jnp.float32)
    w32 = weight.astype(jnp.float32)
    b32 = bias.reshape(1, out_f).astype(jnp.float32)

    # Clamp tiles to the padded problem size; keep everything 128-aligned so
    # every vmatmul is full-width on v5e (128^2) and v6e/v7x (256^2) MXUs.
    tm = min(tm, _round_up(n, 128))
    tn = min(tn, _round_up(out_f, 128))
    tk = min(tk, _round_up(in_f, 128))

    # v7x has 2 TensorCores: if the (i, j) parallel grid would be a single
    # block, split M so both cores get work (harmless on v5e/v6e).
    if _round_up(n, tm) // tm == 1 and _round_up(out_f, tn) // tn == 1 and tm >= 256:
        tm //= 2

    mp = _round_up(n, tm)
    kp = _round_up(in_f, tk)
    np_ = _round_up(out_f, tn)

    # Conditional padding: no extra HBM pass when already tile-aligned.
    # K must be zero-filled whenever kp > in_f to keep the reduction exact.
    xp = _pad_2d(x32, mp, kp)
    wp = _pad_2d(w32, np_, kp)
    bp = _pad_2d(b32, 1, np_)

    grid = (mp // tm, np_ // tn, kp // tk)

    out = pl.pallas_call(
        _linear_tiled_kernel,
        out_shape=jax.ShapeDtypeStruct((mp, np_), jnp.float32),
        grid=grid,
        in_specs=[
            pl.BlockSpec((tm, tk), lambda i, j, k: (i, k)),   # x tile
            pl.BlockSpec((tn, tk), lambda i, j, k: (j, k)),   # weight tile (untransposed)
            pl.BlockSpec((1, tn), lambda i, j, k: (0, j)),    # bias tile
        ],
        out_specs=pl.BlockSpec((tm, tn), lambda i, j, k: (i, j)),
        compiler_params=pltpu.CompilerParams(
            dimension_semantics=("parallel", "parallel", "arbitrary")
        ),
        cost_estimate=pl.CostEstimate(
            flops=2 * mp * np_ * kp,
            transcendentals=0,
            bytes_accessed=4 * (mp * kp + np_ * kp + mp * np_ + np_),
        ),
    )(xp, wp, bp)

    if mp == n and np_ == out_f:
        return out
    return out[:n, :out_f]


# ----------------------------------------------------------------------------
# Public wrapper (dispatch on shape)
# ----------------------------------------------------------------------------
def linear_forward(x, weight, bias):
    """Pallas equivalent of torch.nn.Linear forward: x @ weight.T + bias."""
    n, in_f = x.shape
    out_f, in_f_w = weight.shape
    assert in_f == in_f_w
    assert bias.shape == (out_f,)
    if in_f == 1 and out_f == 1:
        return _linear_forward_scalar(x, weight, bias)
    return _linear_forward_tiled(x, weight, bias)


if __name__ == "__main__":
    key = jax.random.PRNGKey(0)
    kx, kw, kb, kx2, kw2, kb2 = jax.random.split(key, 6)

    # Shapes consistent with the module's usage: x = randn(100, 1) * 10,
    # LR(input_size=1, output_size=1)
    N, IN, OUT = 100, 1, 1

    x = jax.random.normal(kx, (N, IN), dtype=jnp.float32) * 10.0
    bound = 1.0 / jnp.sqrt(jnp.float32(IN))
    weight = jax.random.uniform(kw, (OUT, IN), jnp.float32, -bound, bound)
    bias = jax.random.uniform(kb, (OUT,), jnp.float32, -bound, bound)

    out = linear_forward(x, weight, bias)
    jax.block_until_ready(out)

    ref = x @ weight.T + bias
    assert out.shape == (N, OUT)
    assert jnp.allclose(out, ref, atol=1e-5, rtol=1e-5)

    # Also validate the general tiled path at a small non-degenerate Linear.
    N2, IN2, OUT2 = 64, 32, 16
    x2 = jax.random.normal(kx2, (N2, IN2), jnp.float32)
    w2 = jax.random.normal(kw2, (OUT2, IN2), jnp.float32) * 0.1
    b2 = jax.random.normal(kb2, (OUT2,), jnp.float32)
    out2 = _linear_forward_tiled(x2, w2, b2)
    jax.block_until_ready(out2)
    ref2 = x2 @ w2.T + b2
    assert out2.shape == (N2, OUT2)
    assert jnp.allclose(out2, ref2, atol=1e-4, rtol=1e-4)

    # And a tile-aligned case that exercises the no-padding / multi-K path.
    N3, IN3, OUT3 = 256, 256, 128
    x3 = jax.random.normal(kx2, (N3, IN3), jnp.float32)
    w3 = jax.random.normal(kw2, (OUT3, IN3), jnp.float32) * 0.05
    b3 = jax.random.normal(kb2, (OUT3,), jnp.float32)
    out3 = _linear_forward_tiled(x3, w3, b3, tm=128, tn=128, tk=128)
    jax.block_until_ready(out3)
    ref3 = x3 @ w3.T + b3
    assert out3.shape == (N3, OUT3)
    assert jnp.allclose(out3, ref3, atol=1e-3, rtol=1e-4)

    print("KERNEL_OK")
</pallas_src>

<mosaic_0001>
module attributes {stable_mosaic.version = 11 : i64} {
  func.func @_affine_scalar_kernel(%arg0: memref<2xf32, #tpu.memory_space<smem>>, %arg1: memref<100x1xf32, #tpu.memory_space<vmem>>, %arg2: memref<100x1xf32, #tpu.memory_space<vmem>>) attributes {dimension_semantics = [], scalar_prefetch = 0 : i64, scratch_operands = 0 : i64, tpu.core_type = #tpu.core_type<tc>} {
    %c0 = arith.constant 0 : index
    %c0_0 = arith.constant 0 : index
    %0 = vector.load %arg1[%c0, %c0_0] : memref<100x1xf32, #tpu.memory_space<vmem>>, vector<100x1xf32>
    %c0_1 = arith.constant 0 : index
    %1 = memref.load %arg0[%c0_1] : memref<2xf32, #tpu.memory_space<smem>>
    %2 = vector.broadcast %1 : f32 to vector<100x1xf32>
    %3 = arith.mulf %0, %2 : vector<100x1xf32>
    %c1 = arith.constant 1 : index
    %4 = memref.load %arg0[%c1] : memref<2xf32, #tpu.memory_space<smem>>
    %5 = vector.broadcast %4 : f32 to vector<100x1xf32>
    %6 = arith.addf %3, %5 : vector<100x1xf32>
    %c0_2 = arith.constant 0 : index
    %c0_3 = arith.constant 0 : index
    %7 = vector.load %arg2[%c0_2, %c0_3] : memref<100x1xf32, #tpu.memory_space<vmem>>, vector<100x1xf32>
    tpu.vector_store %arg2[%c0_2, %c0_3], %6 {strides = array<i32>} : memref<100x1xf32, #tpu.memory_space<vmem>>, vector<100x1xf32>,
    return
  }
}

</mosaic_0001>

<bundles_post_ra>
// kernel: tpu_custom_call.1
= control target key start
LH: loop header
LB: loop body
LE: loop exit
PB: predicated region body
PF: predicated region fallthrough
CT: control target
= control target key end

     0   :  { %7 = vsyncpa [#allocation3], 0  ;;  %s103_s12 = smov [#allocation2]   ;;  %s212_s0 = inlined_call_operand.vmem [shape: f32[2], index: 0, kind: input, shape index: {}]   ;;  %s213_s1 = inlined_call_operand.vmem [shape: f32[100,1], index: 1, kind: input, shape index: {}]   ;;  %s214_s2 = inlined_call_operand.vmem [shape: f32[100,1], index: 2, kind: output, shape index: {}]  }
   0x1   :  { %s13_s11 = sshll.u32 %s212_s0, 4  ;;  %s14_s11 = int_to_ptr.vmem [resolvable:$true] %s13_s11 }
   0x2   :  { %16 = dma.vmem_to_smem %s14_s11, 16, %s103_s12, [#allocation3]  }
   0x3   :  { %101 = dma.done.wait [#allocation3], 16  }
   0x4   :  { %102 = vsyncadd [#allocation3], 4294967280 }
   0x5   :  { %23 = sfence }
   0x6   :  { %s37_s13 = sld [smem:[#allocation2]]  ;;  %v24_v0 = vld [vmem:[%s213_s1] sm:$0xff]  ;;  %v25_v1 = vld [vmem:[%s213_s1 + $0x8] sm:$0xff]  ;;  %v26_v2 = vld [vmem:[%s213_s1 + $0x10] sm:$0xff]  ;;  %vm67_vm0 = vcmask 7168   ;;  %vm80_vm1 = vcmask 3072  }
   0x7   :  { %s87_s14 = sld [smem:[#allocation2 + $0x1]]  ;;  %v27_v3 = vld [vmem:[%s213_s1 + $0x18] sm:$0xff]  ;;  %v28_v4 = vld [vmem:[%s213_s1 + $0x20] sm:$0xff]  ;;  %v29_v5 = vld [vmem:[%s213_s1 + $0x28] sm:$0xff] }
   0x8   :  { %v30_v7 = vld [vmem:[%s213_s1 + $0x30] sm:$0xff]  ;;  %v31_v12 = vld [vmem:[%s213_s1 + $0x38] sm:$0xff]  ;;  %v32_v16 = vld [vmem:[%s213_s1 + $0x40] sm:$0xff] }
   0x9   :  { %v33_v21 = vld [vmem:[%s213_s1 + $0x48] sm:$0xff]  ;;  %v34_v24 = vld [vmem:[%s213_s1 + $0x50] sm:$0xff]  ;;  %v35_v27 = vld [vmem:[%s213_s1 + $0x58] sm:$0xff] }
   0xa   :  { %v36_v30 = vld [vmem:[%s213_s1 + $0x60] sm:$0xf] }
   0xc   :  { %v38_v6 = vstv %s37_s13 }
   0xd   :  { %v39_v8 = vmul.f32 %v38_v6, %v24_v0  ;;  %v53_v9 = vstv %s87_s14  ;;  %v40_v10 = vmul.f32 %v38_v6, %v25_v1  ;;  %v41_v11 = vmul.f32 %v38_v6, %v26_v2 }
   0xe   :  { %v42_v13 = vmul.f32 %v38_v6, %v27_v3  ;;  %v43_v14 = vmul.f32 %v38_v6, %v28_v4  ;;  %v44_v15 = vmul.f32 %v38_v6, %v29_v5  ;;  %v45_v20 = vmul.f32 %v38_v6, %v30_v7 }
   0xf   :  { %v54_v17 = vadd.f32 %v53_v9, %v39_v8  ;;  %v55_v18 = vadd.f32 %v53_v9, %v40_v10  ;;  %v56_v19 = vadd.f32 %v53_v9, %v41_v11  ;;  %v46_v23 = vmul.f32 %v38_v6, %v31_v12 }
  0x10   :  { %v57_v22 = vadd.f32 %v53_v9, %v42_v13  ;;  %v58_v25 = vadd.f32 %v53_v9, %v43_v14  ;;  %v47_v26 = vmul.f32 %v38_v6, %v32_v16  ;;  %v59_v28 = vadd.f32 %v53_v9, %v44_v15 }
  0x11   :  { %68 = vst.msk [vmem:[%s214_s2] sm:$0xff] %vm67_vm0, %v54_v17  ;;  %v48_v29 = vmul.f32 %v38_v6, %v33_v21  ;;  %v60_v31 = vadd.f32 %v53_v9, %v45_v20  ;;  %v49_v32 = vmul.f32 %v38_v6, %v34_v24  ;;  %v61_v33 = vadd.f32 %v53_v9, %v46_v23 }
  0x12   :  { %69 = vst.msk [vmem:[%s214_s2 + $0x8] sm:$0xff] %vm67_vm0, %v55_v18  ;;  %v50_v34 = vmul.f32 %v38_v6, %v35_v27  ;;  %v62_v35 = vadd.f32 %v53_v9, %v47_v26  ;;  %v51_v36 = vmul.f32 %v38_v6, %v36_v30 }
  0x13   :  { %70 = vst.msk [vmem:[%s214_s2 + $0x10] sm:$0xff] %vm67_vm0, %v56_v19  ;;  %v63_v37 = vadd.f32 %v53_v9, %v48_v29  ;;  %v64_v38 = vadd.f32 %v53_v9, %v49_v32 }
  0x14   :  { %71 = vst.msk [vmem:[%s214_s2 + $0x18] sm:$0xff] %vm67_vm0, %v57_v22  ;;  %v65_v39 = vadd.f32 %v53_v9, %v50_v34  ;;  %v66_v40 = vadd.f32 %v53_v9, %v51_v36 }
  0x15   :  { %72 = vst.msk [vmem:[%s214_s2 + $0x20] sm:$0xff] %vm67_vm0, %v58_v25 }
  0x16   :  { %73 = vst.msk [vmem:[%s214_s2 + $0x28] sm:$0xff] %vm67_vm0, %v59_v28 }
  0x17   :  { %74 = vst.msk [vmem:[%s214_s2 + $0x30] sm:$0xff] %vm67_vm0, %v60_v31 }
  0x18   :  { %75 = vst.msk [vmem:[%s214_s2 + $0x38] sm:$0xff] %vm67_vm0, %v61_v33 }
  0x19   :  { %76 = vst.msk [vmem:[%s214_s2 + $0x40] sm:$0xff] %vm67_vm0, %v62_v35 }
  0x1a   :  { %77 = vst.msk [vmem:[%s214_s2 + $0x48] sm:$0xff] %vm67_vm0, %v63_v37 }
  0x1b   :  { %78 = vst.msk [vmem:[%s214_s2 + $0x50] sm:$0xff] %vm67_vm0, %v64_v38 }
  0x1c   :  { %79 = vst.msk [vmem:[%s214_s2 + $0x58] sm:$0xff] %vm67_vm0, %v65_v39 }
  0x1d   :  { %81 = vst.msk [vmem:[%s214_s2 + $0x60] sm:$0xf] %vm80_vm1, %v66_v40 }
  0x1e   :  { %86 = vsyncpa [#allocation3], 1 }

</bundles_post_ra>
